<compile_context>
chip_gen: v7x
topology: tpu7x:2x2x1
jax: 0.10.0
libtpu: 0.0.40
codegen_flags: <defaults>
</compile_context>

<pallas_src>
import functools

import jax
import jax.numpy as jnp
from jax.experimental import pallas as pl
from jax.experimental.pallas import tpu as pltpu


_SUPPORTED_LOSSES = ("mse", "l1", "smoothl1", "huber")
_LANES = 128          # lane width of a vreg
_ACC_SUBLANES = 8     # f32 sublane height of a vreg -> (8, 128) accumulator
_CORE_SPLIT = 2       # leading "parallel" grid axis (2 TCs on v7x; harmless on 1-TC chips)


def _round_up(x, m):
    return ((x + m - 1) // m) * m


def _cdiv(a, b):
    return -(-a // b)


# ----------------------------- Pallas kernel -------------------------------

def _content_loss_kernel(x_ref, t_ref, partial_ref, acc_ref, *, loss_kind):
    """Stream (block_rows, 128) tiles; fold each into a (8, 128) vreg partial.

    x_ref, t_ref : (block_rows, 128) tiles of input / target (native dtype)
    partial_ref  : (8, 128) f32 per-core partial-sum output block
    acc_ref      : (8, 128) f32 VMEM accumulator scratch (one vreg)
    """
    i = pl.program_id(1)

    @pl.when(i == 0)
    def _init():
        acc_ref[...] = jnp.zeros_like(acc_ref)

    x = x_ref[...].astype(jnp.float32)
    t = t_ref[...].astype(jnp.float32)
    diff = x - t

    if loss_kind == "mse":
        per = diff * diff
    elif loss_kind == "l1":
        per = jnp.abs(diff)
    elif loss_kind in ("smoothl1", "huber"):
        # beta = delta = 1.0 (PyTorch defaults).
        # TODO(synk): expose beta/delta if non-default values are needed.
        ad = jnp.abs(diff)
        per = jnp.where(ad < 1.0, 0.5 * diff * diff, ad - 0.5)
    else:
        raise ValueError(f"unknown loss function: {loss_kind}")

    # Fold the tile down to one vreg of partial sums: pure VPU adds over the
    # leading (sublane-chunk) axis; no full-tile f32 RMW and no cross-lane
    # reduce anywhere in the kernel.
    acc_ref[...] += jnp.sum(per.reshape(-1, _ACC_SUBLANES, _LANES), axis=0)

    @pl.when(i == pl.num_programs(1) - 1)
    def _finalize():
        partial_ref[...] = acc_ref[...]


# ------------------------------ JAX wrappers --------------------------------

def _vmem_budgets():
    """(per-operand block budget bytes, scoped-vmem limit bytes) per chip gen."""
    try:
        cap = int(pltpu.get_tpu_info().vmem_capacity_bytes)
    except Exception:  # pragma: no cover - conservative fallback
        cap = None
    if cap is not None and cap <= (64 << 20):
        # v7x: 64 MiB physical VMEM per TC -> keep total (2 ops x 2 bufs) ~24 MiB.
        return 6 << 20, 30 << 20
    if cap is not None:
        # v5e / v6e: 128 MiB physical VMEM.
        return 8 << 20, 40 << 20
    return 4 << 20, 24 << 20


def _plan_tiling(n_elems, itemsize, budget_bytes, max_block_rows_override=None):
    """Choose (block_rows, blocks_per_split, rows_padded) for a (rows, 128) slab."""
    # Packed sublane height: 8 for f32, 16 for bf16/f16, 32 for int8/fp8.
    sublane = max(8, 32 // itemsize)
    max_block_rows = (budget_bytes // (_LANES * itemsize)) // sublane * sublane
    max_block_rows = max(sublane, max_block_rows)
    if max_block_rows_override is not None:
        max_block_rows = max(sublane, _round_up(max_block_rows_override, sublane))

    raw_rows = _cdiv(n_elems, _LANES)
    per_split_rows = _round_up(_cdiv(raw_rows, _CORE_SPLIT), sublane)
    blocks_per_split = _cdiv(per_split_rows, max_block_rows)
    # Just-big-enough block: keeps padding bounded by ~split*blocks*sublane rows.
    block_rows = _round_up(_cdiv(per_split_rows, blocks_per_split), sublane)
    rows_padded = _CORE_SPLIT * blocks_per_split * block_rows
    return block_rows, blocks_per_split, rows_padded


def content_loss(x, target, loss_kind="mse", *, max_block_rows=None):
    """Mean element-wise loss between x and target via a tiled Pallas kernel."""
    assert x.shape == target.shape, (x.shape, target.shape)
    if loss_kind not in _SUPPORTED_LOSSES:
        raise ValueError(f"unknown loss function: {loss_kind}")
    if x.dtype != target.dtype:
        target = target.astype(x.dtype)

    n = x.size
    itemsize = jnp.dtype(x.dtype).itemsize
    budget_bytes, vmem_limit = _vmem_budgets()
    block_rows, blocks_per_split, rows_padded = _plan_tiling(
        n, itemsize, budget_bytes, max_block_rows)

    # Flatten to a lane-dense (rows, 128) slab; zero-pad BOTH operands
    # identically so the pad region has diff == 0 (hence 0 loss for every
    # supported loss kind).  inv_n stays 1/true_n.
    n_padded = rows_padded * _LANES
    xf = x.reshape(-1)
    tf = target.reshape(-1)
    if n_padded != n:
        pad = n_padded - n
        xf = jnp.pad(xf, (0, pad))
        tf = jnp.pad(tf, (0, pad))
    x2 = xf.reshape(rows_padded, _LANES)
    t2 = tf.reshape(rows_padded, _LANES)

    kernel = functools.partial(_content_loss_kernel, loss_kind=loss_kind)
    in_map = lambda c, i: (c * blocks_per_split + i, 0)

    partials = pl.pallas_call(
        kernel,
        out_shape=jax.ShapeDtypeStruct(
            (_CORE_SPLIT * _ACC_SUBLANES, _LANES), jnp.float32),
        grid_spec=pltpu.PrefetchScalarGridSpec(
            num_scalar_prefetch=0,
            grid=(_CORE_SPLIT, blocks_per_split),
            in_specs=[
                pl.BlockSpec((block_rows, _LANES), in_map),
                pl.BlockSpec((block_rows, _LANES), in_map),
            ],
            # Per-core (8,128) partial, resident across the inner reduction axis;
            # written once at the last inner step of each core's slice.
            out_specs=pl.BlockSpec((_ACC_SUBLANES, _LANES), lambda c, i: (c, 0)),
            scratch_shapes=[pltpu.VMEM((_ACC_SUBLANES, _LANES), jnp.float32)],
        ),
        compiler_params=pltpu.CompilerParams(
            dimension_semantics=("parallel", "arbitrary"),
            vmem_limit_bytes=vmem_limit,
        ),
        cost_estimate=pl.CostEstimate(
            flops=4 * n_padded,
            transcendentals=0,
            bytes_accessed=(2 * n_padded * itemsize
                            + _CORE_SPLIT * _ACC_SUBLANES * _LANES * 4),
        ),
    )(x2, t2)

    # Tiny final reduce (2 x 8 x 128 partials) + mean scaling in plain XLA.
    return jnp.sum(partials) * (1.0 / float(n))


class ContentLoss:
    """JAX/Pallas port of the PyTorch ContentLoss module (forward only)."""

    def __init__(self, target, loss_function="mse"):
        if loss_function not in _SUPPORTED_LOSSES:
            raise ValueError(f"unknown loss function: {loss_function}")
        # .detach() in PyTorch -> stop_gradient here
        self.target = jax.lax.stop_gradient(target)
        self.loss_kind = loss_function
        self.loss = None

    def __call__(self, x):
        # TODO(synk): jax.custom_vjp so grads of self.loss flow through the Pallas call.
        self.loss = content_loss(x, self.target, self.loss_kind)
        return x  # forward returns its input unchanged


# --------------------------------- main --------------------------------------

if __name__ == "__main__":
    key = jax.random.PRNGKey(0)
    k_t, k_x, k_t2, k_x2 = jax.random.split(key, 4)

    # NCHW shapes consistent with a conv feature map: (batch=2, ch=4, 16, 16)
    target = jax.random.normal(k_t, (2, 4, 16, 16), dtype=jnp.float32)
    x = jax.random.normal(k_x, (2, 4, 16, 16), dtype=jnp.float32)

    module = ContentLoss(target, loss_function="mse")
    out = jax.block_until_ready(module(x))
    loss = jax.block_until_ready(module.loss)

    # Pure-JAX references
    mse_ref = jnp.mean((x - target) ** 2)
    l1_ref = jnp.mean(jnp.abs(x - target))
    d = x - target
    ad = jnp.abs(d)
    sl1_ref = jnp.mean(jnp.where(ad < 1.0, 0.5 * d * d, ad - 0.5))

    assert out.shape == x.shape and bool(jnp.allclose(out, x))
    assert bool(jnp.allclose(loss, mse_ref, rtol=1e-5, atol=1e-6)), (loss, mse_ref)

    loss_l1 = jax.block_until_ready(content_loss(x, target, "l1"))
    assert bool(jnp.allclose(loss_l1, l1_ref, rtol=1e-5, atol=1e-6)), (loss_l1, l1_ref)

    loss_sl1 = jax.block_until_ready(content_loss(x, target, "smoothl1"))
    assert bool(jnp.allclose(loss_sl1, sl1_ref, rtol=1e-5, atol=1e-6)), (loss_sl1, sl1_ref)

    # Odd (non-multiple-of-128) shape: exercises the zero-padding path.
    t_odd = jax.random.normal(k_t2, (3, 5, 7), dtype=jnp.float32)
    x_odd = jax.random.normal(k_x2, (3, 5, 7), dtype=jnp.float32)
    loss_odd = jax.block_until_ready(content_loss(x_odd, t_odd, "mse"))
    ref_odd = jnp.mean((x_odd - t_odd) ** 2)
    assert bool(jnp.allclose(loss_odd, ref_odd, rtol=1e-5, atol=1e-6)), (loss_odd, ref_odd)

    # Force several inner grid steps (multi-block accumulating path).
    t_big = jax.random.normal(k_t, (2, 4, 32, 32), dtype=jnp.float32)
    x_big = jax.random.normal(k_x, (2, 4, 32, 32), dtype=jnp.float32)
    loss_big = jax.block_until_ready(
        content_loss(x_big, t_big, "mse", max_block_rows=8))
    ref_big = jnp.mean((x_big - t_big) ** 2)
    assert bool(jnp.allclose(loss_big, ref_big, rtol=1e-5, atol=1e-6)), (loss_big, ref_big)

    print("KERNEL_OK")
</pallas_src>

<mosaic_0001>
module attributes {stable_mosaic.version = 11 : i64} {
  func.func @_content_loss_kernel(%arg0: i32, %arg1: i32, %arg2: memref<8x128xf32, #tpu.memory_space<vmem>>, %arg3: memref<8x128xf32, #tpu.memory_space<vmem>>, %arg4: memref<8x128xf32, #tpu.memory_space<vmem>>, %arg5: memref<8x128xf32, #tpu.memory_space<vmem>>) attributes {dimension_semantics = [#tpu.dimension_semantics<parallel>, #tpu.dimension_semantics<arbitrary>], iteration_bounds = array<i64: 2, 1>, scalar_prefetch = 0 : i64, scratch_operands = 1 : i64, tpu.core_type = #tpu.core_type<tc>, window_params = [{transform_indices = @transform_0, window_bounds = array<i64: 8, 128>}, {transform_indices = @transform_1, window_bounds = array<i64: 8, 128>}, {transform_indices = @transform_2, window_bounds = array<i64: 8, 128>}]} {
    %c0_i32 = arith.constant 0 : i32
    %0 = arith.cmpi eq, %arg1, %c0_i32 : i32
    %1 = arith.extui %0 : i1 to i32
    %c0_i32_0 = arith.constant 0 : i32
    %2 = arith.cmpi ne, %1, %c0_i32_0 : i32
    scf.if %2 {
      %cst_10 = arith.constant 0.000000e+00 : f32
      %15 = vector.broadcast %cst_10 : f32 to vector<8x128xf32>
      %c0_11 = arith.constant 0 : index
      %c0_12 = arith.constant 0 : index
      %16 = vector.load %arg5[%c0_11, %c0_12] : memref<8x128xf32, #tpu.memory_space<vmem>>, vector<8x128xf32>
      tpu.vector_store %arg5[%c0_11, %c0_12], %15 {strides = array<i32>} : memref<8x128xf32, #tpu.memory_space<vmem>>, vector<8x128xf32>,
    } else {
    }
    %c0 = arith.constant 0 : index
    %c0_1 = arith.constant 0 : index
    %3 = vector.load %arg2[%c0, %c0_1] : memref<8x128xf32, #tpu.memory_space<vmem>>, vector<8x128xf32>
    %c0_2 = arith.constant 0 : index
    %c0_3 = arith.constant 0 : index
    %4 = vector.load %arg3[%c0_2, %c0_3] : memref<8x128xf32, #tpu.memory_space<vmem>>, vector<8x128xf32>
    %5 = arith.subf %3, %4 : vector<8x128xf32>
    %6 = arith.mulf %5, %5 : vector<8x128xf32>
    %c0_4 = arith.constant 0 : index
    %c0_5 = arith.constant 0 : index
    %7 = vector.load %arg5[%c0_4, %c0_5] : memref<8x128xf32, #tpu.memory_space<vmem>>, vector<8x128xf32>
    %8 = vector.shape_cast %6 : vector<8x128xf32> to vector<1x8x128xf32>
    %cst = arith.constant dense<0.000000e+00> : vector<8x128xf32>
    %9 = vector.multi_reduction <add>, %8, %cst [0] : vector<1x8x128xf32> to vector<8x128xf32>
    %10 = arith.addf %7, %9 : vector<8x128xf32>
    %c0_6 = arith.constant 0 : index
    %c0_7 = arith.constant 0 : index
    %11 = vector.load %arg5[%c0_6, %c0_7] : memref<8x128xf32, #tpu.memory_space<vmem>>, vector<8x128xf32>
    tpu.vector_store %arg5[%c0_6, %c0_7], %10 {strides = array<i32>} : memref<8x128xf32, #tpu.memory_space<vmem>>, vector<8x128xf32>,
    %c0_i32_8 = arith.constant 0 : i32
    %12 = arith.cmpi eq, %arg1, %c0_i32_8 : i32
    %13 = arith.extui %12 : i1 to i32
    %c0_i32_9 = arith.constant 0 : i32
    %14 = arith.cmpi ne, %13, %c0_i32_9 : i32
    scf.if %14 {
      %c0_10 = arith.constant 0 : index
      %c0_11 = arith.constant 0 : index
      %15 = vector.load %arg5[%c0_10, %c0_11] : memref<8x128xf32, #tpu.memory_space<vmem>>, vector<8x128xf32>
      %c0_12 = arith.constant 0 : index
      %c0_13 = arith.constant 0 : index
      %16 = vector.load %arg4[%c0_12, %c0_13] : memref<8x128xf32, #tpu.memory_space<vmem>>, vector<8x128xf32>
      tpu.vector_store %arg4[%c0_12, %c0_13], %15 {strides = array<i32>} : memref<8x128xf32, #tpu.memory_space<vmem>>, vector<8x128xf32>,
    } else {
    }
    return
  }
  func.func @transform_0(%arg0: i32, %arg1: i32) -> (i32, i32) {
    %c1_i32 = arith.constant 1 : i32
    %0 = arith.muli %arg0, %c1_i32 : i32
    %1 = arith.addi %0, %arg1 : i32
    %c0_i32 = arith.constant 0 : i32
    %c0_i32_0 = arith.constant 0 : i32
    return %1, %c0_i32 : i32, i32
  }
  func.func @transform_1(%arg0: i32, %arg1: i32) -> (i32, i32) {
    %c1_i32 = arith.constant 1 : i32
    %0 = arith.muli %arg0, %c1_i32 : i32
    %1 = arith.addi %0, %arg1 : i32
    %c0_i32 = arith.constant 0 : i32
    %c0_i32_0 = arith.constant 0 : i32
    return %1, %c0_i32 : i32, i32
  }
  func.func @transform_2(%arg0: i32, %arg1: i32) -> (i32, i32) {
    %c0_i32 = arith.constant 0 : i32
    %c0_i32_0 = arith.constant 0 : i32
    return %arg0, %c0_i32 : i32, i32
  }
}

</mosaic_0001>

<bundles_post_ra>
// kernel: tpu_custom_call.1
= control target key start
LH: loop header
LB: loop body
LE: loop exit
PB: predicated region body
PF: predicated region fallthrough
CT: control target
= control target key end

     0   :  { %7 = vsyncpa [#allocation4], 0  ;;  %s820_s0 = inlined_call_operand.hbm [shape: f32[16,128], index: 0, kind: input, shape index: {}]   ;;  %s821_s1 = inlined_call_operand.hbm [shape: f32[16,128], index: 1, kind: input, shape index: {}]   ;;  %s822_s2 = inlined_call_operand.hbm [shape: f32[16,128], index: 2, kind: output, shape index: {}]  }
   0x1   :  { %9 = vsyncpa [#allocation4 + $0x1], 0 }
   0x2   :  { %10 = vsyncpa [#allocation7], 0 }
   0x3   :  { %12 = vsyncpa [#allocation7 + $0x1], 0 }
   0x4   :  { %13 = vsyncpa [#allocation5], 0 }
   0x5   :  { %15 = vsyncpa [#allocation5 + $0x1], 0  ;;  %s600_s9 = smov 0   ;;  %s602_s10 = smov 0  }
   0x6   :  { %s604_s11 = smov 0   ;;  %s606_s12 = smov 0  }
   0x7   :  { %s608_s13 = smov 0   ;;  %s610_s14 = smov 0  }
   0x8 LB: > { %s351_s15 = sadd.s32 4294967295, %s580_s14   ;;  %s352_s16 = sadd.s32 4294967294, %s580_s14   ;;  %s580_s14 = sphi %s610_s14, %s21_s14   ;;  %s576_s13 = sphi %s608_s13, %s842_s13   ;;  %s572_s12 = sphi %s606_s12, %s841_s12   ;;  %s568_s11 = sphi %s604_s11, %s840_s11   ;;  %s564_s10 = sphi %s602_s10, %s839_s10   ;;  %s560_s9 = sphi %s600_s9, %s838_s9  }
   0x9   : > { %s33_s17 = sadd.s32 1, %s576_s13  ;;  %s42_s18 = sadd.s32 1, %s568_s11 }
   0xa   : > { %p35_p0 = scmp.ge.s32.totalorder %s33_s17, 2  ;;  %p49_p1 = scmp.ne.s32.totalorder %s568_s11, %s564_s10 }
   0xb   : > { %p50_p2 = scmp.eq.s32.totalorder %s580_s14, 0  ;;  %p55_p3 = scmp.ne.s32.totalorder %s564_s10, %s560_s9 }
   0xc   : > { %s844_s17 = smov (%p35_p0, %s33_s17), 0  ;;  %p56_p5 = scmp.eq.s32.totalorder %s351_s15, 0 }
   0xd   : > { %p641_p4 = por %p50_p2, %p49_p1  ;;  %s39_s20 = ssub.s32 %s576_s13, %s844_s17 }
   0xe   : > { %p107_p6 = scmp.eq.s32.totalorder %s351_s15, 1  ;;  %p40_p7 = scmp.eq.s32.totalorder %s39_s20, 0 }
   0xf   : > { %p647_p8 = por %p56_p5, %p55_p3  ;;  %p113_p10 = scmp.eq.s32.totalorder %s352_s16, 1 }
  0x10   : > { %p651_p9 = por %p107_p6, %p49_p1  ;;  %p384_p13 = scmp.lt.s32.totalorder %s580_s14, 2 }
  0x11   : > { %s826_s21 = scalar_select %p647_p8, 1, 0 }
  0x12   : > { %s827_s22 = scalar_select %p651_p9, 1, 0 }
  0x13   : > { %s656_s23 = scalar_select %p40_p7, %s568_s11, %s42_s18  }
  0x14   : > { %p658_p11 = por %p113_p10, %p55_p3  ;;  %s665_s25 = sand.u32 1, %s568_s11  }
  0x15   : > { %s355_s26 = sshll.u32 %s665_s25, 3  ;;  %s356_s27 = sshll.u32 %s576_s13, 7 }
  0x16   : > { %s828_s24 = scalar_select %p658_p11, 1, 0 }
  0x17   : > { %s674_s30 = scalar_lea.hbm %s820_s0, %s356_s27  ;;  %s137_s3 = scalar_lea.vmem [#allocation3], %s355_s26 }
  0x18   : > { %s145_s4 = sshll.u32 %s137_s3, 4  ;;  %p682_p0 = pnand %p384_p13, %p641_p4  ;;  %s678_s4 = int_to_ptr.vmem [resolvable:$true] %s145_s4 }
  0x19   : > { %s134_s6 = scalar_lea.sflag [#allocation4], %s665_s25  ;;  %s434_s7 = scalar_lea.hbm %s674_s30, 128 }
  0x1a   : > { %p435_p3 = scmp.ne.s32.totalorder %s674_s30, %s434_s7  ;;  %p436_p5 = pneg %p682_p0 }
  0x1b   : > { %s439_s16 = scalar_lea.hbm %s820_s0, 256  ;;  %p440_p4 = scmp.lt.u32.totalorder %s674_s30, %s820_s0 }
  0x1c   : > { %p437_p6 = pnand %p436_p5, %p435_p3  ;;  %p441_p10 = scmp.lt.u32.totalorder %s439_s16, %s434_s7 }
  0x1d   : > { %p443_p12 = scmp.lt.u32.totalorder %s434_s7, %s674_s30 }
  0x1e   : > { %p438_p7 = pneg %p437_p6  ;;  %p442_p13 = por %p441_p10, %p440_p4 }
  0x20   : > { %p444_p1 = por %p443_p12, %p442_p13 }
  0x22   : > { %p445_p2 = pnand %p444_p1, %p438_p7 }
  0x24   : > { %448 = shalt.err (!%p445_p2)
}
  0x25   : > { %s449_s20 = scalar_lea.vmem %s678_s4, 128  ;;  %s582_s28 = smov [#allocation3]  }
  0x26   : > { %p450_p3 = scmp.ne.s32.totalorder %s678_s4, %s449_s20  ;;  %s454_s29 = sshll.u32 %s582_s28, 4  ;;  %s455_s29 = int_to_ptr.vmem [resolvable:$false] %s454_s29 }
  0x27   : > { %s456_s3 = scalar_lea.vmem %s455_s29, 256  ;;  %p457_p9 = scmp.lt.s32.totalorder %s678_s4, %s455_s29 }
  0x28   : > { %p452_p6 = pnand %p450_p3, %p436_p5  ;;  %p458_p4 = scmp.lt.s32.totalorder %s456_s3, %s449_s20 }
  0x2a   : > { %p453_p11 = pneg %p452_p6  ;;  %p459_p10 = por %p458_p4, %p457_p9 }
  0x2c   : > { %p460_p12 = pnand %p459_p10, %p453_p11 }
  0x2e   : > { %463 = shalt.err (!%p460_p12)
}
  0x2f   : > { %376 = dma.hbm_to_vmem [thread:$0]  (!%p682_p0), %s674_s30, 128, %s678_s4, %s134_s6  }
  0x30   : > { %p830_p1 = scmp.lt.s32.totalorder %s580_s14, 3  ;;  %p831_p2 = scmp.ge.s32.totalorder %s580_s14, 1 }
  0x31   : > { %s727_s16 = scalar_lea.hbm %s821_s1, %s356_s27  ;;  %s156_s18 = scalar_lea.vmem [#allocation6], %s355_s26 }
  0x32   : > { %p718_p7 = pnand %p831_p2, %p830_p1  ;;  %s164_s19 = sshll.u32 %s156_s18, 4  ;;  %s165_s19 = int_to_ptr.vmem [resolvable:$true] %s164_s19 }
  0x33   : > { %s153_s30 = scalar_lea.sflag [#allocation7], %s665_s25  ;;  %s464_s4 = scalar_lea.hbm %s727_s16, 128 }
  0x34   : > { %s832_s7 = scalar_select %p718_p7, 1, 0 }
  0x35   : > { %p465_p9 = scmp.ne.s32.totalorder %s727_s16, %s464_s4  ;;  %s469_s27 = scalar_lea.hbm %s821_s1, 256 }
  0x36   : > { %p470_p3 = scmp.lt.u32.totalorder %s727_s16, %s821_s1  ;;  %p471_p6 = scmp.lt.u32.totalorder %s469_s27, %s464_s4 }
  0x37   : > { %p467_p11 = pnand %p465_p9, %p436_p5  ;;  %p473_p10 = scmp.lt.u32.totalorder %s464_s4, %s727_s16 }
  0x38   : > { %p472_p4 = por %p471_p6, %p470_p3 }
  0x39   : > { %p468_p13 = pneg %p467_p11 }
  0x3a   : > { %p474_p12 = por %p473_p10, %p472_p4 }
  0x3c   : > { %p475_p1 = pnand %p474_p12, %p468_p13 }
  0x3e   : > { %478 = shalt.err (!%p475_p1)
}
  0x3f   : > { %s479_s25 = scalar_lea.vmem %s165_s19, 128  ;;  %s583_s26 = smov [#allocation6]  }
  0x40   : > { %p480_p2 = scmp.ne.s32.totalorder %s165_s19, %s479_s25  ;;  %s484_s3 = sshll.u32 %s583_s26, 4  ;;  %s485_s3 = int_to_ptr.vmem [resolvable:$false] %s484_s3 }
  0x41   : > { %s486_s8 = scalar_lea.vmem %s485_s3, 256  ;;  %p487_p8 = scmp.lt.s32.totalorder %s165_s19, %s485_s3 }
  0x42   : > { %p482_p9 = pnand %p480_p2, %p436_p5  ;;  %p488_p7 = scmp.lt.s32.totalorder %s486_s8, %s479_s25 }
  0x44   : > { %p483_p11 = pneg %p482_p9  ;;  %p489_p3 = por %p488_p7, %p487_p8 }
  0x46   : > { %p490_p6 = pnand %p489_p3, %p483_p11 }
  0x48   : > { %493 = shalt.err (!%p490_p6)
}
  0x49   : > { %379 = dma.hbm_to_vmem [thread:$0]  (!%p682_p0), %s727_s16, 128, %s165_s19, %s153_s30  }
  0x4a   : > { %p833_p13 = scmp.ne.s32.totalorder %s832_s7, 0 }
  0x4b   : > { %s754_s15 = sand.u32 (!%p833_p13), 1, %s564_s10   ;;  %p834_p5 = scmp.ne.s32.totalorder (!%p833_p13), %s826_s21, 0 }
  0x4c   : > { %173 = sbr.rel (%p833_p13) target bundleno = 112 (0x70), region = 28  ;;  %s360_s18 = sshll.u32 (!%p833_p13), %s754_s15, 3 }
  0x4d   : > { %s176_s4 = scalar_lea.sflag (!%p833_p13), [#allocation4], %s754_s15  ;;  %s179_s6 = scalar_lea.vmem (!%p833_p13), [#allocation3], %s360_s18 }
  0x53   : > { %547 = dma.done.wait (%p834_p5), %s176_s4, 128  }
  0x54   : > { %549 = vsyncadd (%p834_p5), %s176_s4, 4294967168  ;;  %s185_s5 = scalar_lea.sflag [#allocation7], %s754_s15  ;;  %s188_s16 = scalar_lea.vmem [#allocation6], %s360_s18 }
  0x55   : > { %551 = dma.done.wait (%p834_p5), %s185_s5, 128  }
  0x56   : > { %553 = vsyncadd (%p834_p5), %s185_s5, 4294967168  ;;  %v221_v0 = vld [vmem:[%s179_s6] sm:$0xff]  ;;  %v222_v1 = vld [vmem:[%s188_s16] sm:$0xff]  ;;  %s213_s7 = scalar_lea.vmem [#allocation8], %s360_s18  ;;  %s364_s30 = sshll.u32 %s572_s12, 7 }
  0x57   : > { %s248_s19 = sshll.u32 %s213_s7, 4  ;;  %v223_v2 = vsub.f32 %v221_v0, %v222_v1  ;;  %s773_s21 = scalar_lea.hbm %s822_s2, %s364_s30  ;;  %s768_s19 = int_to_ptr.vmem [resolvable:$true] %s248_s19 }
  0x58   : > { %s235_s28 = scalar_lea.sflag [#allocation5], %s754_s15  ;;  %s494_s29 = scalar_lea.vmem %s768_s19, 128 }
  0x59   : > { %v224_v3 = vmul.f32 %v223_v2, %v223_v2  ;;  %p495_p8 = scmp.ne.s32.totalorder %s768_s19, %s494_s29  ;;  %p835_p0 = scmp.ne.s32.totalorder %s827_s22, 0 }
  0x5a   : > { %s584_s12 = smov [#allocation8]  }
  0x5b   : > { %233 = vst [vmem:[%s213_s7] sm:$0xff] %v224_v3  ;;  %p496_p7 = pnand %p495_p8, %p835_p0  ;;  %s498_s25 = sshll.u32 %s584_s12, 4  ;;  %s499_s25 = int_to_ptr.vmem [resolvable:$false] %s498_s25 }
  0x5c   : > { %s500_s26 = scalar_lea.vmem %s499_s25, 256  ;;  %p501_p10 = scmp.lt.s32.totalorder %s768_s19, %s499_s25 }
  0x5d   : > { %p497_p4 = pneg %p496_p7  ;;  %p502_p12 = scmp.lt.s32.totalorder %s500_s26, %s494_s29 }
  0x5f   : > { %p503_p1 = por %p502_p12, %p501_p10 }
  0x61   : > { %p504_p2 = pnand %p503_p1, %p497_p4 }
  0x63   : > { %507 = shalt.err (!%p504_p2)
}
  0x64   : > { %s508_s3 = scalar_lea.hbm %s773_s21, 128  ;;  %s512_s18 = scalar_lea.hbm %s822_s2, 256 }
  0x65   : > { %p509_p9 = scmp.ne.s32.totalorder %s773_s21, %s508_s3  ;;  %p513_p6 = scmp.lt.u32.totalorder %s773_s21, %s822_s2 }
  0x66   : > { %p514_p13 = scmp.lt.u32.totalorder %s512_s18, %s508_s3  ;;  %p516_p8 = scmp.lt.u32.totalorder %s508_s3, %s773_s21 }
  0x67   : > { %p510_p11 = pnand %p509_p9, %p835_p0 }
  0x68   : > { %p515_p5 = por %p514_p13, %p513_p6 }
  0x69   : > { %p511_p3 = pneg %p510_p11 }
  0x6a   : > { %p517_p7 = por %p516_p8, %p515_p5 }
  0x6c   : > { %p518_p4 = pnand %p517_p7, %p511_p3 }
  0x6e   : > { %521 = shalt.err (!%p518_p4)
}
  0x6f   : > { %371 = dma.vmem_to_hbm [thread:$0]  (%p835_p0), %s768_s19, 128, %s773_s21, %s235_s28  }
  0x70 PF: > { %s260_s5 = sand.u32 1, %s560_s9   ;;  %p836_p10 = scmp.ne.s32.totalorder %s828_s24, 0 }
  0x71   : > { %p837_p12 = scmp.ge.s32.totalorder %s580_s14, 2  ;;  %s261_s16 = scalar_lea.sflag [#allocation5], %s260_s5 }
  0x73   : > { %p381_p1 = pnand %p837_p12, %p836_p10 }
  0x75   : > { %555 = dma.done.wait (!%p381_p1), %s261_s16, 128  }
  0x76   : > { %557 = vsyncadd (!%p381_p1), %s261_s16, 4294967168  ;;  %s21_s14 = sadd.s32 1, %s580_s14   ;;  %s838_s9 = smov %s564_s10 }
  0x77   : > { %p18_p2 = scmp.ge.s32.totalorder %s21_s14, 4   ;;  %s839_s10 = smov %s568_s11 }
  0x78   : > { %s840_s11 = smov %s656_s23  ;;  %s841_s12 = smov %s576_s13 }
  0x79   : > { %s842_s13 = smov %s844_s17  ;;  %20 = sbr.rel (!%p18_p2) target bundleno = 8 (0x8), region = 94 }
  0x80   :  { %266 = vsyncpa [#allocation4], 1 }
  0x81   :  { %268 = vsyncpa [#allocation4 + $0x1], 1 }
  0x82   :  { %269 = vsyncpa [#allocation7], 1 }
  0x83   :  { %271 = vsyncpa [#allocation7 + $0x1], 1 }
  0x84   :  { %272 = vsyncpa [#allocation5], 1 }
  0x85   :  { %274 = vsyncpa [#allocation5 + $0x1], 1 }

</bundles_post_ra>
